<compile_context>
chip_gen: v6e
topology: v6e:2x2x1
jax: 0.10.0
libtpu: 0.0.40
codegen_flags: <defaults>
</compile_context>

<pallas_src>
import numpy as np
import jax
import jax.numpy as jnp
from jax.experimental import pallas as pl
from jax.experimental.pallas import tpu as pltpu

HIDDEN = 64
PACK = 8                 # f32 sublane count: pack 8 batch rows -> 1 lane-dense row
MAX_BLOCK_ROWS = 2048    # packed rows per grid step (= 16384 batch rows, ~3 MiB/step)
MIN_SPLIT_ROWS = 256     # don't split into 2 steps (v7x megacore) below this tile


def _orthogonal(key, shape, gain):
    """Deterministic orthogonal init (same spirit as torch.nn.init.orthogonal_)."""
    rows, cols = shape
    flat_shape = (max(rows, cols), min(rows, cols))
    a = jax.random.normal(key, flat_shape, dtype=jnp.float32)
    q, r = jnp.linalg.qr(a)
    d = jnp.diagonal(r)
    q = q * jnp.where(d >= 0, 1.0, -1.0)   # sign fix; never zeros a column
    if rows < cols:
        q = q.T
    return gain * q[:rows, :cols]


def make_teacher_params(key, input_dim, output_dim):
    """Orthogonal(gain=sqrt(2)) weights, zero biases — mirrors TeacherModel.__init__.
    PyTorch Linear weight is (out, in); we store (in, out) so the kernel does x @ W."""
    k1, k2 = jax.random.split(key)
    gain = float(np.sqrt(2.0))
    w1 = _orthogonal(k1, (input_dim, HIDDEN), gain)
    w2 = _orthogonal(k2, (HIDDEN, output_dim), gain)
    b1 = jnp.zeros((HIDDEN,), jnp.float32)
    b2 = jnp.zeros((output_dim,), jnp.float32)
    return w1, b1, w2, b2


def _block_diag(w, n):
    """n copies of w along the diagonal."""
    r, c = w.shape
    out = jnp.zeros((n * r, n * c), w.dtype)
    for s in range(n):
        out = out.at[s * r:(s + 1) * r, s * c:(s + 1) * c].set(w)
    return out


def pack_teacher_params(w1, b1, w2, b2, *, pack=PACK):
    """Build the packed kernel params ONCE (hoisted out of the jitted forward)."""
    w1_bd = _block_diag(w1, pack).astype(jnp.bfloat16)          # (pack*d_in,  pack*hidden)
    w2_bd = _block_diag(w2, pack).astype(jnp.bfloat16)          # (pack*hidden, pack*d_out)
    b1_t = jnp.tile(b1, pack).reshape(1, pack * b1.shape[0]).astype(jnp.float32)
    b2_t = jnp.tile(b2, pack).reshape(1, pack * b2.shape[0]).astype(jnp.float32)
    return w1_bd, b1_t, w2_bd, b2_t


def _mlp_packed_kernel(x_ref, w1_ref, b1_ref, w2_ref, b2_ref, o_ref):
    # Biases hoisted once as f32 values (single broadcast per tile).
    b1 = b1_ref[...]
    b2 = b2_ref[...]
    # In-kernel f32 -> bf16 cast (VPU, hidden under DMA/MXU slack). x streams as
    # f32 from HBM; no separate XLA cast pass.
    x = x_ref[...].astype(jnp.bfloat16)
    # Layer 1: bf16 x bf16 MXU matmul, f32 accumulate, bias + ReLU on the VPU.
    h = jnp.dot(x, w1_ref[...], preferred_element_type=jnp.float32)
    h = jnp.maximum(h + b1, 0.0)
    # Layer 2.
    o = jnp.dot(h.astype(jnp.bfloat16), w2_ref[...],
                preferred_element_type=jnp.float32)
    o = jnp.maximum(o + b2, 0.0)
    o_ref[...] = o.astype(o_ref.dtype)


def _choose_block_rows(n_rows):
    """Adaptive packed-row tile: big enough to amortize the ~0.35us/step overhead,
    even step count (when worthwhile) so v7x's two TCs split the batch evenly."""
    n_steps = max(1, pl.cdiv(n_rows, MAX_BLOCK_ROWS))
    if n_steps % 2 == 1 and pl.cdiv(n_rows, n_steps + 1) >= MIN_SPLIT_ROWS:
        n_steps += 1
    block_rows = pl.cdiv(n_rows, n_steps)
    return max(8, pl.cdiv(block_rows, 8) * 8)   # f32 sublane multiple


def teacher_model_forward(x, w1_bd, b1_t, w2_bd, b2_t, *, pack=PACK,
                          out_dtype=jnp.float32):
    """x: (B, d_in) f32. Packed params from pack_teacher_params. Returns (B, d_out)."""
    B, d_in = x.shape
    hidden_p = w1_bd.shape[1]           # pack * hidden
    d_out_p = w2_bd.shape[1]            # pack * d_out
    d_out = d_out_p // pack
    assert w1_bd.shape[0] == pack * d_in and w2_bd.shape[0] == hidden_p

    # ---- layout plumbing (cheap): pack `pack` rows -> 1 lane-dense row ----
    n_rows = pl.cdiv(B, pack)
    b_pad = n_rows * pack                                        # pad <= pack-1 rows
    x_p = jnp.pad(x, ((0, b_pad - B), (0, 0))) if b_pad != B else x
    x2 = x_p.reshape(n_rows, pack * d_in)                        # row-major: no copy

    block_rows = _choose_block_rows(n_rows)
    grid = (pl.cdiv(n_rows, block_rows),)   # ragged last block: OOB loads only feed
                                            # rows whose (masked) outputs are dropped

    o2 = pl.pallas_call(
        _mlp_packed_kernel,
        out_shape=jax.ShapeDtypeStruct((n_rows, d_out_p), out_dtype),
        grid_spec=pltpu.PrefetchScalarGridSpec(
            num_scalar_prefetch=0,
            grid=grid,
            in_specs=[
                # x stream (f32, double-buffered by the BlockSpec pipeline). If
                # profiling shows exposed DMA, sweep pipeline_mode=pl.Buffered(3).
                pl.BlockSpec((block_rows, pack * d_in), lambda i: (i, 0)),
                pl.BlockSpec((pack * d_in, hidden_p), lambda i: (0, 0)),   # W1 (resident)
                pl.BlockSpec((1, hidden_p), lambda i: (0, 0)),             # b1
                pl.BlockSpec((hidden_p, d_out_p), lambda i: (0, 0)),       # W2 (resident)
                pl.BlockSpec((1, d_out_p), lambda i: (0, 0)),              # b2
            ],
            out_specs=pl.BlockSpec((block_rows, d_out_p), lambda i: (i, 0)),
        ),
        compiler_params=pltpu.CompilerParams(
            # "parallel": v7x's two TensorCores split the batch grid; harmless on 1-TC chips.
            dimension_semantics=("parallel",),
            # ~15 MiB actually used at the max tile; 32 MiB is safe on v5e/v6e/v7x.
            vmem_limit_bytes=32 * 1024 * 1024,
        ),
    )(x2, w1_bd, b1_t, w2_bd, b2_t)

    out = o2.reshape(b_pad, d_out)
    return out[:B] if b_pad != B else out


def reference_forward(x, w1, b1, w2, b2):
    """Plain-JAX reference mirroring the kernel numerics (bf16 operands, f32 accumulate)."""
    f32 = jnp.float32
    xb = x.astype(jnp.bfloat16).astype(f32)
    w1b = w1.astype(jnp.bfloat16).astype(f32)
    w2b = w2.astype(jnp.bfloat16).astype(f32)
    h = jnp.maximum(xb @ w1b + b1, 0.0)
    hb = h.astype(jnp.bfloat16).astype(f32)
    return jnp.maximum(hb @ w2b + b2, 0.0)


if __name__ == "__main__":
    input_dim, output_dim = 32, 16

    key = jax.random.PRNGKey(0)
    kx, kp, kx2 = jax.random.split(key, 3)
    w1, b1, w2, b2 = make_teacher_params(kp, input_dim, output_dim)
    packed = pack_teacher_params(w1, b1, w2, b2)   # built once, outside the jit

    fwd = jax.jit(teacher_model_forward)

    # Small shape consistent with the module (single-step grid).
    batch = 64
    x = jax.random.normal(kx, (batch, input_dim), dtype=jnp.float32)
    out = jax.block_until_ready(fwd(x, *packed))
    ref = reference_forward(x, w1, b1, w2, b2)
    np.testing.assert_allclose(np.asarray(out), np.asarray(ref), rtol=1e-2, atol=1e-2)

    # Larger batch, not a multiple of 8: exercises the <=7-row pad, the even
    # 2-step "parallel" grid, and the masked ragged last block.
    batch2 = 8230
    x_big = jax.random.normal(kx2, (batch2, input_dim), dtype=jnp.float32)
    out_big = jax.block_until_ready(fwd(x_big, *packed))
    ref_big = reference_forward(x_big, w1, b1, w2, b2)
    np.testing.assert_allclose(np.asarray(out_big), np.asarray(ref_big), rtol=1e-2, atol=1e-2)

    print("KERNEL_OK")
</pallas_src>

<mosaic_0001>
module attributes {stable_mosaic.version = 11 : i64} {
  func.func @_mlp_packed_kernel(%arg0: i32, %arg1: memref<8x256xf32, #tpu.memory_space<vmem>>, %arg2: memref<256x512xbf16, #tpu.memory_space<vmem>>, %arg3: memref<1x512xf32, #tpu.memory_space<vmem>>, %arg4: memref<512x128xbf16, #tpu.memory_space<vmem>>, %arg5: memref<1x128xf32, #tpu.memory_space<vmem>>, %arg6: memref<8x128xf32, #tpu.memory_space<vmem>>) attributes {dimension_semantics = [#tpu.dimension_semantics<parallel>], iteration_bounds = array<i64: 1>, scalar_prefetch = 0 : i64, scratch_operands = 0 : i64, tpu.core_type = #tpu.core_type<tc>, window_params = [{transform_indices = @transform_0, window_bounds = array<i64: 8, 256>}, {pipeline_mode = #tpu.pipeline_mode<synchronous>, transform_indices = @transform_1, window_bounds = array<i64: 256, 512>}, {pipeline_mode = #tpu.pipeline_mode<synchronous>, transform_indices = @transform_2, window_bounds = array<i64: 1, 512>}, {pipeline_mode = #tpu.pipeline_mode<synchronous>, transform_indices = @transform_3, window_bounds = array<i64: 512, 128>}, {pipeline_mode = #tpu.pipeline_mode<synchronous>, transform_indices = @transform_4, window_bounds = array<i64: 1, 128>}, {transform_indices = @transform_5, window_bounds = array<i64: 8, 128>}]} {
    %c0 = arith.constant 0 : index
    %c0_0 = arith.constant 0 : index
    %0 = vector.load %arg3[%c0, %c0_0] : memref<1x512xf32, #tpu.memory_space<vmem>>, vector<1x512xf32>
    %c0_1 = arith.constant 0 : index
    %c0_2 = arith.constant 0 : index
    %1 = vector.load %arg5[%c0_1, %c0_2] : memref<1x128xf32, #tpu.memory_space<vmem>>, vector<1x128xf32>
    %c0_3 = arith.constant 0 : index
    %c0_4 = arith.constant 0 : index
    %2 = vector.load %arg1[%c0_3, %c0_4] : memref<8x256xf32, #tpu.memory_space<vmem>>, vector<8x256xf32>
    %3 = arith.truncf %2 : vector<8x256xf32> to vector<8x256xbf16>
    %c0_5 = arith.constant 0 : index
    %c0_6 = arith.constant 0 : index
    %4 = vector.load %arg2[%c0_5, %c0_6] : memref<256x512xbf16, #tpu.memory_space<vmem>>, vector<256x512xbf16>
    %cst = arith.constant dense<0.000000e+00> : vector<8x512xf32>
    %5 = tpu.matmul %3, %4, %cst {dimension_numbers = #tpu.dot_dimension_numbers<[1], [0], [0], [1], [0, 0, 1, 1], [], []>} : vector<8x256xbf16>, vector<256x512xbf16>, vector<8x512xf32> -> vector<8x512xf32>
    %6 = vector.broadcast %0 : vector<1x512xf32> to vector<8x512xf32>
    %7 = arith.addf %5, %6 : vector<8x512xf32>
    %cst_7 = arith.constant 0.000000e+00 : f32
    %8 = vector.broadcast %cst_7 : f32 to vector<8x512xf32>
    %9 = arith.maximumf %7, %8 : vector<8x512xf32>
    %10 = arith.truncf %9 : vector<8x512xf32> to vector<8x512xbf16>
    %c0_8 = arith.constant 0 : index
    %c0_9 = arith.constant 0 : index
    %11 = vector.load %arg4[%c0_8, %c0_9] : memref<512x128xbf16, #tpu.memory_space<vmem>>, vector<512x128xbf16>
    %cst_10 = arith.constant dense<0.000000e+00> : vector<8x128xf32>
    %12 = tpu.matmul %10, %11, %cst_10 {dimension_numbers = #tpu.dot_dimension_numbers<[1], [0], [0], [1], [0, 0, 1, 1], [], []>} : vector<8x512xbf16>, vector<512x128xbf16>, vector<8x128xf32> -> vector<8x128xf32>
    %13 = vector.broadcast %1 : vector<1x128xf32> to vector<8x128xf32>
    %14 = arith.addf %12, %13 : vector<8x128xf32>
    %cst_11 = arith.constant 0.000000e+00 : f32
    %15 = vector.broadcast %cst_11 : f32 to vector<8x128xf32>
    %16 = arith.maximumf %14, %15 : vector<8x128xf32>
    %c0_12 = arith.constant 0 : index
    %c0_13 = arith.constant 0 : index
    %17 = vector.load %arg6[%c0_12, %c0_13] : memref<8x128xf32, #tpu.memory_space<vmem>>, vector<8x128xf32>
    tpu.vector_store %arg6[%c0_12, %c0_13], %16 {strides = array<i32>} : memref<8x128xf32, #tpu.memory_space<vmem>>, vector<8x128xf32>,
    return
  }
  func.func @transform_0(%arg0: i32) -> (i32, i32) {
    %c0_i32 = arith.constant 0 : i32
    %c0_i32_0 = arith.constant 0 : i32
    return %arg0, %c0_i32 : i32, i32
  }
  func.func @transform_1(%arg0: i32) -> (i32, i32) {
    %c0_i32 = arith.constant 0 : i32
    %c0_i32_0 = arith.constant 0 : i32
    %c0_i32_1 = arith.constant 0 : i32
    return %c0_i32, %c0_i32_0 : i32, i32
  }
  func.func @transform_2(%arg0: i32) -> (i32, i32) {
    %c0_i32 = arith.constant 0 : i32
    %c0_i32_0 = arith.constant 0 : i32
    %c0_i32_1 = arith.constant 0 : i32
    return %c0_i32, %c0_i32_0 : i32, i32
  }
  func.func @transform_3(%arg0: i32) -> (i32, i32) {
    %c0_i32 = arith.constant 0 : i32
    %c0_i32_0 = arith.constant 0 : i32
    %c0_i32_1 = arith.constant 0 : i32
    return %c0_i32, %c0_i32_0 : i32, i32
  }
  func.func @transform_4(%arg0: i32) -> (i32, i32) {
    %c0_i32 = arith.constant 0 : i32
    %c0_i32_0 = arith.constant 0 : i32
    %c0_i32_1 = arith.constant 0 : i32
    return %c0_i32, %c0_i32_0 : i32, i32
  }
  func.func @transform_5(%arg0: i32) -> (i32, i32) {
    %c0_i32 = arith.constant 0 : i32
    %c0_i32_0 = arith.constant 0 : i32
    return %arg0, %c0_i32 : i32, i32
  }
}

</mosaic_0001>

<bundles_post_ra>
// kernel: teacher_model_forward.1
= control target key start
LH: loop header
LB: loop body
LE: loop exit
PB: predicated region body
PF: predicated region fallthrough
CT: control target
= control target key end

     0   :  { %10 = vsyncpa [#allocation3], 0  ;;  %s1276_s0 = inlined_call_operand.vmem [shape: f32[8,256], index: 0, kind: input, shape index: {}]   ;;  %s1277_s1 = inlined_call_operand.hbm [shape: bf16[256,512], index: 1, kind: input, shape index: {}]   ;;  %s1278_s2 = inlined_call_operand.vmem [shape: f32[1,512], index: 2, kind: input, shape index: {}]   ;;  %s1279_s3 = inlined_call_operand.hbm [shape: bf16[512,128], index: 3, kind: input, shape index: {}]   ;;  %s1280_s4 = inlined_call_operand.vmem [shape: f32[1,128], index: 4, kind: input, shape index: {}]   ;;  %s1281_s5 = inlined_call_operand.vmem [shape: f32[8,128], index: 5, kind: output, shape index: {}]  }
   0x1   :  { %11 = vsyncpa [#allocation5], 0  ;;  %s1219_s18 = smov [#allocation2]  }
   0x2   :  { %s19_s19 = sshll.u32 %s1219_s18, 4  ;;  %s20_s19 = int_to_ptr.vmem [resolvable:$true] %s19_s19 }
   0x3   :  { %s1183_s20 = scalar_lea.vmem %s20_s19, 8192  ;;  %p1188_p1 = scmp.lt.s32.totalorder %s20_s19, %s20_s19 }
   0x4   :  { %p1184_p0 = scmp.ne.s32.totalorder %s20_s19, %s1183_s20  ;;  %p1189_p2 = scmp.lt.s32.totalorder %s1183_s20, %s1183_s20 }
   0x6   :  { %p1190_p3 = por %p1189_p2, %p1188_p1 }
   0x8   :  { %p1191_p4 = pnand %p1190_p3, %p1184_p0 }
   0xa   :  { %1194 = shalt.err (!%p1191_p4)
}
   0xb   :  { %s1220_s21 = smov 256   ;;  %s1221_s22 = smov 16  }
   0xc   :  { %25 = dma.hbm_to_vmem [thread:$0]  %s1277_s1, 8192, %s20_s19, [#allocation3], %s1220_s21, %s1220_s21, %s1221_s22  }
   0xd   :  { %s1222_s25 = smov [#allocation4]  }
   0xe   :  { %s33_s26 = sshll.u32 %s1222_s25, 4  ;;  %s34_s26 = int_to_ptr.vmem [resolvable:$true] %s33_s26 }
   0xf   :  { %s1203_s27 = scalar_lea.vmem %s34_s26, 4096  ;;  %p1208_p6 = scmp.lt.s32.totalorder %s34_s26, %s34_s26 }
  0x10   :  { %p1204_p5 = scmp.ne.s32.totalorder %s34_s26, %s1203_s27  ;;  %p1209_p7 = scmp.lt.s32.totalorder %s1203_s27, %s1203_s27 }
  0x12   :  { %p1210_p8 = por %p1209_p7, %p1208_p6 }
  0x14   :  { %p1211_p9 = pnand %p1210_p8, %p1204_p5 }
  0x16   :  { %1214 = shalt.err (!%p1211_p9)
}
  0x17   :  { %s1223_s28 = smov 64   ;;  %s1224_s29 = smov 4  }
  0x18   :  { %39 = dma.hbm_to_vmem [thread:$0]  %s1279_s3, 4096, %s34_s26, [#allocation5], %s1223_s28, %s1223_s28, %s1224_s29  }
  0x19   :  { %1215 = dma.done.wait [#allocation3], 8192  }
  0x1a   :  { %1216 = vsyncadd [#allocation3], 4294959104 }
  0x1b   :  { %1217 = dma.done.wait [#allocation5], 4096  }
  0x1c   :  { %1218 = vsyncadd [#allocation5], 4294963200  ;;  %v1047_v0 = vld [vmem:[#allocation2 + $0xe4] ss:$16 sps:$4 sm:$0xff]   ;;  %v1049_v1 = vld [vmem:[#allocation2 + $0xec] ss:$16 sps:$4 sm:$0xff]  }
  0x1d   :  { %460 = vmatprep.subr.bf16.mxu0 %v1047_v0  ;;  %v1051_v2 = vld [vmem:[#allocation2 + $0xe0] ss:$16 sps:$4 sm:$0xff]   ;;  %v1052_v3 = vld [vmem:[#allocation2 + $0xe8] ss:$16 sps:$4 sm:$0xff]   ;;  %501 = vmatprep.subr.bf16.mxu1 %v1049_v1  ;;  %v1053_v4 = vld [vmem:[#allocation2 + $0xc4] ss:$16 sps:$4 sm:$0xff]  }
  0x1e   :  { %461 = vmatpush1.bf16.msra.mxu0 %v1051_v2  ;;  %502 = vmatpush1.bf16.msra.mxu1 %v1052_v3  ;;  %v1055_v5 = vld [vmem:[#allocation2 + $0xcc] ss:$16 sps:$4 sm:$0xff]   ;;  %v1057_v6 = vld [vmem:[#allocation2 + $0xc0] ss:$16 sps:$4 sm:$0xff]   ;;  %v1058_v7 = vld [vmem:[#allocation2 + $0xc8] ss:$16 sps:$4 sm:$0xff]  }
  0x1f   :  { %462 = vmatprep.subr.bf16.mxu0 %v1053_v4  ;;  %503 = vmatprep.subr.bf16.mxu1 %v1055_v5  ;;  %v1059_v8 = vld [vmem:[#allocation2 + $0xa4] ss:$16 sps:$4 sm:$0xff]   ;;  %v1061_v9 = vld [vmem:[#allocation2 + $0xac] ss:$16 sps:$4 sm:$0xff]   ;;  %v1063_v10 = vld [vmem:[#allocation2 + $0xa0] ss:$16 sps:$4 sm:$0xff]  }
  0x20   :  { %v1064_v11 = vld [vmem:[#allocation2 + $0xa8] ss:$16 sps:$4 sm:$0xff]   ;;  %v1065_v12 = vld [vmem:[#allocation2 + $0x84] ss:$16 sps:$4 sm:$0xff]   ;;  %v1067_v13 = vld [vmem:[#allocation2 + $0x8c] ss:$16 sps:$4 sm:$0xff]  }
  0x21   :  { %v1069_v14 = vld [vmem:[#allocation2 + $0x80] ss:$16 sps:$4 sm:$0xff]   ;;  %v1070_v15 = vld [vmem:[#allocation2 + $0x88] ss:$16 sps:$4 sm:$0xff]   ;;  %v1071_v16 = vld [vmem:[#allocation2 + $0x64] ss:$16 sps:$4 sm:$0xff]  }
  0x22   :  { %463 = vmatpush1.bf16.msra.mxu0 %v1057_v6  ;;  %504 = vmatpush1.bf16.msra.mxu1 %v1058_v7  ;;  %v1073_v17 = vld [vmem:[#allocation2 + $0x6c] ss:$16 sps:$4 sm:$0xff]   ;;  %v1075_v18 = vld [vmem:[#allocation2 + $0x60] ss:$16 sps:$4 sm:$0xff]   ;;  %v1076_v19 = vld [vmem:[#allocation2 + $0x68] ss:$16 sps:$4 sm:$0xff]  }
  0x23   :  { %464 = vmatprep.subr.bf16.mxu0 %v1059_v8  ;;  %505 = vmatprep.subr.bf16.mxu1 %v1061_v9  ;;  %v1077_v20 = vld [vmem:[#allocation2 + $0x44] ss:$16 sps:$4 sm:$0xff]   ;;  %v1079_v21 = vld [vmem:[#allocation2 + $0x4c] ss:$16 sps:$4 sm:$0xff]   ;;  %v1081_v22 = vld [vmem:[#allocation2 + $0x40] ss:$16 sps:$4 sm:$0xff]  }
  0x24   :  { %v1082_v23 = vld [vmem:[#allocation2 + $0x48] ss:$16 sps:$4 sm:$0xff]   ;;  %v1083_v24 = vld [vmem:[#allocation2 + $0x24] ss:$16 sps:$4 sm:$0xff]   ;;  %v1085_v25 = vld [vmem:[#allocation2 + $0x2c] ss:$16 sps:$4 sm:$0xff]  }
  0x25   :  { %v1087_v26 = vld [vmem:[#allocation2 + $0x20] ss:$16 sps:$4 sm:$0xff]   ;;  %v1088_v27 = vld [vmem:[#allocation2 + $0x28] ss:$16 sps:$4 sm:$0xff]   ;;  %v1089_v28 = vld [vmem:[#allocation2 + $0x4] ss:$16 sps:$4 sm:$0xff]  }
  0x26   :  { %465 = vmatpush1.bf16.msra.mxu0 %v1063_v10  ;;  %506 = vmatpush1.bf16.msra.mxu1 %v1064_v11  ;;  %v1091_v29 = vld [vmem:[#allocation2 + $0xc] ss:$16 sps:$4 sm:$0xff]   ;;  %v1093_v30 = vld [vmem:[#allocation2] ss:$16 sps:$4 sm:$0xff]   ;;  %v1094_v31 = vld [vmem:[#allocation2 + $0x8] ss:$16 sps:$4 sm:$0xff]  }
  0x27   :  { %466 = vmatprep.subr.bf16.mxu0 %v1065_v12  ;;  %507 = vmatprep.subr.bf16.mxu1 %v1067_v13  ;;  %v1095_v32 = vld [vmem:[#allocation2 + $0x1e4] ss:$16 sps:$4 sm:$0xff]   ;;  %v1097_v33 = vld [vmem:[#allocation2 + $0x1ec] ss:$16 sps:$4 sm:$0xff]   ;;  %v1099_v34 = vld [vmem:[#allocation2 + $0x1e0] ss:$16 sps:$4 sm:$0xff]  }
  0x28   :  { %v1100_v35 = vld [vmem:[#allocation2 + $0x1e8] ss:$16 sps:$4 sm:$0xff]   ;;  %v1101_v36 = vld [vmem:[#allocation2 + $0x1c4] ss:$16 sps:$4 sm:$0xff]   ;;  %v1103_v37 = vld [vmem:[#allocation2 + $0x1cc] ss:$16 sps:$4 sm:$0xff]  }
  0x29   :  { %v1105_v38 = vld [vmem:[#allocation2 + $0x1c0] ss:$16 sps:$4 sm:$0xff]   ;;  %v1106_v39 = vld [vmem:[#allocation2 + $0x1c8] ss:$16 sps:$4 sm:$0xff]   ;;  %v1107_v40 = vld [vmem:[#allocation2 + $0x1a4] ss:$16 sps:$4 sm:$0xff]  }
  0x2a   :  { %467 = vmatpush1.bf16.msra.mxu0 %v1069_v14  ;;  %508 = vmatpush1.bf16.msra.mxu1 %v1070_v15  ;;  %v1109_v41 = vld [vmem:[#allocation2 + $0x1ac] ss:$16 sps:$4 sm:$0xff]   ;;  %v1111_v42 = vld [vmem:[#allocation2 + $0x1a0] ss:$16 sps:$4 sm:$0xff]   ;;  %v1112_v43 = vld [vmem:[#allocation2 + $0x1a8] ss:$16 sps:$4 sm:$0xff]  }
  0x2b   :  { %468 = vmatprep.subr.bf16.mxu0 %v1071_v16  ;;  %509 = vmatprep.subr.bf16.mxu1 %v1073_v17  ;;  %v1113_v44 = vld [vmem:[#allocation2 + $0x184] ss:$16 sps:$4 sm:$0xff]   ;;  %v1115_v45 = vld [vmem:[#allocation2 + $0x18c] ss:$16 sps:$4 sm:$0xff]   ;;  %v1117_v46 = vld [vmem:[#allocation2 + $0x180] ss:$16 sps:$4 sm:$0xff]  }
  0x2c   :  { %v52_v47 = vld [vmem:[%s1276_s0 + $0x8] sm:$0xff]  ;;  %v1119_v50 = vld [vmem:[#allocation2 + $0x164] ss:$16 sps:$4 sm:$0xff]   ;;  %v1123_v52 = vld [vmem:[#allocation2 + $0x160] ss:$16 sps:$4 sm:$0xff]  }
  0x2d   :  { %v1118_v48 = vld [vmem:[#allocation2 + $0x188] ss:$16 sps:$4 sm:$0xff]   ;;  %v54_v49 = vpack.c.bf16 %v52_v47, %v52_v47  ;;  %v1121_v51 = vld [vmem:[#allocation2 + $0x16c] ss:$16 sps:$4 sm:$0xff]   ;;  %v1125_v54 = vld [vmem:[#allocation2 + $0x144] ss:$16 sps:$4 sm:$0xff]  }
  0x2e   :  { %469 = vmatpush1.bf16.msra.mxu0 %v1075_v18  ;;  %510 = vmatpush1.bf16.msra.mxu1 %v1076_v19  ;;  %v1124_v53 = vld [vmem:[#allocation2 + $0x168] ss:$16 sps:$4 sm:$0xff]   ;;  %v1127_v55 = vld [vmem:[#allocation2 + $0x14c] ss:$16 sps:$4 sm:$0xff]   ;;  %v1129_v56 = vld [vmem:[#allocation2 + $0x140] ss:$16 sps:$4 sm:$0xff]  }
  0x2f   :  { %470 = vmatprep.subr.bf16.mxu0 %v1077_v20  ;;  %511 = vmatprep.subr.bf16.mxu1 %v1079_v21  ;;  %v1130_v57 = vld [vmem:[#allocation2 + $0x148] ss:$16 sps:$4 sm:$0xff]   ;;  %v1131_v58 = vld [vmem:[#allocation2 + $0x124] ss:$16 sps:$4 sm:$0xff]   ;;  %v1133_v59 = vld [vmem:[#allocation2 + $0x12c] ss:$16 sps:$4 sm:$0xff]  }
  0x30   :  { %492 = vmatprep.mubr.bf16.mxu0 %v54_v49  ;;  %533 = vmatprep.mubr.bf16.mxu1 %v54_v49  ;;  %v1135_v60 = vld [vmem:[#allocation2 + $0x120] ss:$16 sps:$4 sm:$0xff]   ;;  %v1136_v61 = vld [vmem:[#allocation2 + $0x128] ss:$16 sps:$4 sm:$0xff]   ;;  %v1137_v62 = vld [vmem:[#allocation2 + $0x104] ss:$16 sps:$4 sm:$0xff]  }
  0x31   :  { %v1139_v63 = vld [vmem:[#allocation2 + $0x10c] ss:$16 sps:$4 sm:$0xff]   ;;  %v1141_v0 = vld [vmem:[#allocation2 + $0x100] ss:$16 sps:$4 sm:$0xff]   ;;  %v1142_v1 = vld [vmem:[#allocation2 + $0x108] ss:$16 sps:$4 sm:$0xff]  }
  0x32   :  { %471 = vmatpush1.bf16.msra.mxu0 %v1081_v22  ;;  %512 = vmatpush1.bf16.msra.mxu1 %v1082_v23  ;;  %v51_v2 = vld [vmem:[%s1276_s0] sm:$0xff]  ;;  %v1143_v3 = vld [vmem:[#allocation4 + $0x78] sm:$0xff]   ;;  %v1147_v8 = vld [vmem:[#allocation4 + $0x70] sm:$0xff]  }
  0x33   :  { %472 = vmatprep.subr.bf16.mxu0 %v1083_v24  ;;  %513 = vmatprep.subr.bf16.mxu1 %v1085_v25  ;;  %v1144_v4 = vld [vmem:[#allocation4 + $0xf8] sm:$0xff]   ;;  %v53_v6 = vpack.c.bf16 %v51_v2, %v51_v2  ;;  %v1148_v9 = vld [vmem:[#allocation4 + $0xf0] sm:$0xff]   ;;  %v1151_v12 = vld [vmem:[#allocation4 + $0x68] sm:$0xff]  }
  0x34   :  { %v1145_v5 = vld [vmem:[#allocation4 + $0x38] sm:$0xff]   ;;  %v1149_v10 = vld [vmem:[#allocation4 + $0x30] sm:$0xff]   ;;  %v1152_v13 = vld [vmem:[#allocation4 + $0xe8] sm:$0xff]  }
  0x35   :  { %v1146_v7 = vld [vmem:[#allocation4 + $0xb8] sm:$0xff]   ;;  %v1150_v11 = vld [vmem:[#allocation4 + $0xb0] sm:$0xff]   ;;  %v1153_v14 = vld [vmem:[#allocation4 + $0x28] sm:$0xff]  }
  0x36   :  { %473 = vmatpush1.bf16.msra.mxu0 %v1087_v26  ;;  %514 = vmatpush1.bf16.msra.mxu1 %v1088_v27  ;;  %v1154_v15 = vld [vmem:[#allocation4 + $0xa8] sm:$0xff]   ;;  %v1155_v16 = vld [vmem:[#allocation4 + $0x60] sm:$0xff]   ;;  %v1159_v20 = vld [vmem:[#allocation4 + $0x58] sm:$0xff]  }
  0x37   :  { %474 = vmatprep.subr.bf16.mxu0 %v1089_v28  ;;  %515 = vmatprep.subr.bf16.mxu1 %v1091_v29  ;;  %v1156_v17 = vld [vmem:[#allocation4 + $0xe0] sm:$0xff]   ;;  %v1160_v21 = vld [vmem:[#allocation4 + $0xd8] sm:$0xff]   ;;  %v1163_v24 = vld [vmem:[#allocation4 + $0x50] sm:$0xff]  }
  0x38   :  { %v1157_v18 = vld [vmem:[#allocation4 + $0x20] sm:$0xff]   ;;  %v1161_v22 = vld [vmem:[#allocation4 + $0x18] sm:$0xff]   ;;  %v1164_v25 = vld [vmem:[#allocation4 + $0xd0] sm:$0xff]  }
  0x39   :  { %v1158_v19 = vld [vmem:[#allocation4 + $0xa0] sm:$0xff]   ;;  %v1162_v23 = vld [vmem:[#allocation4 + $0x98] sm:$0xff]   ;;  %v1165_v26 = vld [vmem:[#allocation4 + $0x10] sm:$0xff]  }
  0x3a   :  { %475 = vmatpush1.bf16.msra.mxu0 %v1093_v30  ;;  %516 = vmatpush1.bf16.msra.mxu1 %v1094_v31  ;;  %v1166_v27 = vld [vmem:[#allocation4 + $0x90] sm:$0xff]   ;;  %v1167_v28 = vld [vmem:[#allocation4 + $0x48] sm:$0xff]  }
  0x3b   :  { %476 = vmatprep.subr.bf16.mxu0 %v1095_v32  ;;  %517 = vmatprep.subr.bf16.mxu1 %v1097_v33  ;;  %v1168_v29 = vld [vmem:[#allocation4 + $0xc8] sm:$0xff]   ;;  %v1171_v32 = vld [vmem:[#allocation4 + $0x40] sm:$0xff]  }
  0x3c   :  { %v1169_v30 = vld [vmem:[#allocation4 + $0x8] sm:$0xff]   ;;  %v1172_v33 = vld [vmem:[#allocation4 + $0xc0] sm:$0xff]  }
  0x3d   :  { %v1170_v31 = vld [vmem:[#allocation4 + $0x88] sm:$0xff]  }
  0x3e   :  { %477 = vmatpush2.bf16.msra.mxu0 %v1099_v34  ;;  %518 = vmatpush2.bf16.msra.mxu1 %v1100_v35  ;;  %v1173_v34 = vld [vmem:[#allocation4] sm:$0xff]  }
  0x3f   :  { %478 = vmatprep.subr.bf16.mxu0 %v1101_v36  ;;  %519 = vmatprep.subr.bf16.mxu1 %v1103_v37  ;;  %v1174_v35 = vld [vmem:[#allocation4 + $0x80] sm:$0xff]   ;;  %v120_v36 = vlaneseq }
  0x41   :  { %v121_v37 = vshrl.u32 %v120_v36, 7 }
  0x42   :  { %479 = vmatpush2.bf16.msra.mxu0 %v1105_v38  ;;  %520 = vmatpush2.bf16.msra.mxu1 %v1106_v39 }
  0x43   :  { %480 = vmatprep.subr.bf16.mxu0 %v1107_v40  ;;  %521 = vmatprep.subr.bf16.mxu1 %v1109_v41  ;;  %v122_v38 = vsub.s32 0, %v121_v37  ;;  %v130_v39 = vsub.s32 2, %v121_v37  ;;  %v49_v40 = vld [vmem:[%s1278_s2] sm:$0xf]  ;;  %v126_v41 = vsub.s32 1, %v121_v37 }
  0x46   :  { %481 = vmatpush2.bf16.msra.mxu0 %v1111_v42  ;;  %522 = vmatpush2.bf16.msra.mxu1 %v1112_v43  ;;  %v134_v42 = vsub.s32 3, %v121_v37  ;;  %v123_v43 = vrot.slane %v49_v40, %v122_v38 }
  0x47   :  { %482 = vmatprep.subr.bf16.mxu0 %v1113_v44  ;;  %523 = vmatprep.subr.bf16.mxu1 %v1115_v45  ;;  %v131_v44 = vrot.slane %v49_v40, %v130_v39  ;;  %v127_v45 = vrot.slane %v49_v40, %v126_v41 }
  0x4a   :  { %483 = vmatpush2.bf16.msra.mxu0 %v1117_v46  ;;  %524 = vmatpush2.bf16.msra.mxu1 %v1118_v48  ;;  %v135_v46 = vrot.slane %v49_v40, %v134_v42 }
  0x4b   :  { %484 = vmatprep.subr.bf16.mxu0 %v1119_v50  ;;  %525 = vmatprep.subr.bf16.mxu1 %v1121_v51 }
  0x4e   :  { %485 = vmatpush2.bf16.msra.mxu0 %v1123_v52  ;;  %526 = vmatpush2.bf16.msra.mxu1 %v1124_v53 }
  0x4f   :  { %486 = vmatprep.subr.bf16.mxu0 %v1125_v54  ;;  %527 = vmatprep.subr.bf16.mxu1 %v1127_v55 }
  0x52   :  { %487 = vmatpush2.bf16.msra.mxu0 %v1129_v56  ;;  %528 = vmatpush2.bf16.msra.mxu1 %v1130_v57 }
  0x53   :  { %488 = vmatprep.subr.bf16.mxu0 %v1131_v58  ;;  %529 = vmatprep.subr.bf16.mxu1 %v1133_v59 }
  0x56   :  { %489 = vmatpush2.bf16.msra.mxu0 %v1135_v60  ;;  %530 = vmatpush2.bf16.msra.mxu1 %v1136_v61 }
  0x57   :  { %490 = vmatprep.subr.bf16.mxu0 %v1137_v62  ;;  %531 = vmatprep.subr.bf16.mxu1 %v1139_v63 }
  0x5a   :  { %491 = vmatpush2.bf16.msra.mxu0 %v1141_v0  ;;  %532 = vmatpush2.bf16.msra.mxu1 %v1142_v1 }
  0x5b   :  { %997 = vmatprep.subr.bf16.mxu0 %v1143_v3  ;;  %1019 = vmatprep.subr.bf16.mxu1 %v1144_v4 }
  0x5d   :  { %493 = vmatmul.mubr.bf16.vlgmr.msra.gmra.mxu0 %v53_v6  ;;  %534 = vmatmul.mubr.bf16.vlgmr.msra.gmra.mxu1 %v53_v6 }
  0x5e   :  { %998 = vmatpush3.bf16.msra.mxu0 %v1145_v5  ;;  %1020 = vmatpush3.bf16.msra.mxu1 %v1146_v7  ;;  %v964_v5 = vld [vmem:[%s1280_s4] ss:$0 sm:$0xff] }
  0x5f   :  { %999 = vmatprep.subr.bf16.mxu0 %v1147_v8  ;;  %1021 = vmatprep.subr.bf16.mxu1 %v1148_v9 }
  0x62   :  { %1000 = vmatpush3.bf16.msra.mxu0 %v1149_v10  ;;  %1022 = vmatpush3.bf16.msra.mxu1 %v1150_v11 }
  0x63   :  { %1001 = vmatprep.subr.bf16.mxu0 %v1151_v12  ;;  %1023 = vmatprep.subr.bf16.mxu1 %v1152_v13 }
  0x66   :  { %1002 = vmatpush3.bf16.msra.mxu0 %v1153_v14  ;;  %1024 = vmatpush3.bf16.msra.mxu1 %v1154_v15 }
  0x67   :  { %1003 = vmatprep.subr.bf16.mxu0 %v1155_v16  ;;  %1025 = vmatprep.subr.bf16.mxu1 %v1156_v17 }
  0x6a   :  { %1004 = vmatpush3.bf16.msra.mxu0 %v1157_v18  ;;  %1026 = vmatpush3.bf16.msra.mxu1 %v1158_v19 }
  0x6b   :  { %1005 = vmatprep.subr.bf16.mxu0 %v1159_v20  ;;  %1027 = vmatprep.subr.bf16.mxu1 %v1160_v21 }
  0x6e   :  { %1006 = vmatpush3.bf16.msra.mxu0 %v1161_v22  ;;  %1028 = vmatpush3.bf16.msra.mxu1 %v1162_v23 }
  0x6f   :  { %1007 = vmatprep.subr.bf16.mxu0 %v1163_v24  ;;  %1029 = vmatprep.subr.bf16.mxu1 %v1164_v25 }
  0x72   :  { %1008 = vmatpush3.bf16.msra.mxu0 %v1165_v26  ;;  %1030 = vmatpush3.bf16.msra.mxu1 %v1166_v27 }
  0x73   :  { %1009 = vmatprep.subr.bf16.mxu0 %v1167_v28  ;;  %1031 = vmatprep.subr.bf16.mxu1 %v1168_v29 }
  0x76   :  { %1010 = vmatpush3.bf16.msra.mxu0 %v1169_v30  ;;  %1032 = vmatpush3.bf16.msra.mxu1 %v1170_v31 }
  0x77   :  { %1011 = vmatprep.subr.bf16.mxu0 %v1171_v32  ;;  %1033 = vmatprep.subr.bf16.mxu1 %v1172_v33 }
  0x7a   :  { %1012 = vmatpush3.bf16.msra.mxu0 %v1173_v34  ;;  %1034 = vmatpush3.bf16.msra.mxu1 %v1174_v35 }
 0x11d   :  { %v494_v47 = vpop.f32.mrf.mxu0  ;;  %v535_v48 = vpop.f32.mrf.mxu1 }
 0x11e   :  { %v495_v49 = vadd.f32 %v494_v47, %v123_v43  ;;  %v536_v50 = vadd.f32 %v535_v48, %v131_v44 }
 0x11f   :  { %v496_v51 = vpop.f32.mrf.mxu0  ;;  %v537_v52 = vpop.f32.mrf.mxu1 }
 0x120   :  { %v544_v53 = vmax.f32 %v536_v50, 0.0  ;;  %v497_v54 = vadd.f32 %v496_v51, %v127_v45  ;;  %v538_v55 = vadd.f32 %v537_v52, %v135_v46  ;;  %v542_v56 = vmax.f32 %v495_v49, 0.0 }
 0x121   :  { %v498_v57 = vpop.f32.mrf.mxu0  ;;  %v539_v58 = vpop.f32.mrf.mxu1 }
 0x122   :  { %v543_v59 = vmax.f32 %v497_v54, 0.0  ;;  %v545_v60 = vmax.f32 %v538_v55, 0.0  ;;  %v548_v61 = vpack.c.bf16 %v544_v53, %v544_v53  ;;  %v546_v2 = vpack.c.bf16 %v542_v56, %v542_v56 }
 0x123   :  { %v499_v62 = vpop.f32.mrf.mxu0  ;;  %v540_v63 = vpop.f32.mrf.mxu1 }
 0x124   :  { %v547_v0 = vpack.c.bf16 %v543_v59, %v543_v59  ;;  %v549_v1 = vpack.c.bf16 %v545_v60, %v545_v60 }
 0x126   :  { %844 = vmatprep.mubr.bf16.mxu0 %v547_v0  ;;  %884 = vmatprep.mubr.bf16.mxu1 %v549_v1 }
 0x127   :  { %845 = vmatmul.mubr.bf16.vlgmr.msra.gmra.mxu0 %v546_v2  ;;  %885 = vmatmul.mubr.bf16.vlgmr.msra.gmra.mxu1 %v548_v61 }
 0x1e7   :  { %v1013_v3 = vpop.f32.mrf.mxu0  ;;  %v1035_v4 = vpop.f32.mrf.mxu1 }
 0x1e9   :  { %v1014_v6 = vpop.f32.mrf.mxu0  ;;  %v1036_v7 = vpop.f32.mrf.mxu1 }
 0x1ea   :  { %v1015_v8 = vadd.f32 %v1014_v6, %v1013_v3  ;;  %v1037_v12 = vadd.f32 %v1036_v7, %v1035_v4 }
 0x1eb   :  { %v1016_v9 = vpop.f32.mrf.mxu0  ;;  %v1038_v10 = vpop.f32.mrf.mxu1 }
 0x1ec   :  { %v847_v11 = vadd.f32 %v1015_v8, %v964_v5 }
 0x1ed   :  { %v1017_v13 = vpop.f32.mrf.mxu0  ;;  %v1039_v14 = vpop.f32.mrf.mxu1 }
 0x1ee   :  { %v887_v15 = vadd.f32 %v1037_v12, %v847_v11 }
 0x1f0   :  { %v892_v16 = vmax.f32 %v887_v15, 0.0 }
 0x1f2   :  { %893 = vst [vmem:[%s1281_s5] sm:$0xff] %v892_v16 }
 0x1f3   :  { %898 = vsyncpa [#allocation3], 1 }
 0x1f4   :  { %899 = vsyncpa [#allocation5], 1 }

</bundles_post_ra>
